<compile_context>
chip_gen: v5e
topology: v5e:2x2
jax: 0.10.0
libtpu: 0.0.40
codegen_flags: <defaults>
</compile_context>

<pallas_src>
import jax
import jax.numpy as jnp
from jax import lax
from jax.experimental import pallas as pl
from jax.experimental.pallas import tpu as pltpu

EPS = 1e-5                            # PyTorch BatchNorm2d default
VMEM_LIMIT = 48 * 1024 * 1024         # scoped-VMEM budget; < physical on all gens
TILE_VMEM_BUDGET = 20 * 1024 * 1024   # soft budget for the double-buffered tiles


def _stats_kernel(x_ref, gram_ref, sum_ref):
    """Pass 1: per-n accumulate G = X X^T and per-channel sums of X (f32 acc)."""
    @pl.when(pl.program_id(1) == 0)
    def _init():
        gram_ref[...] = jnp.zeros_like(gram_ref)
        sum_ref[...] = jnp.zeros_like(sum_ref)

    x = x_ref[...]                                              # [Cin, tS] bf16
    gram_ref[...] += lax.dot_general(                           # X @ X^T on the MXU
        x, x, (((1,), (1,)), ((), ())), preferred_element_type=jnp.float32)
    sum_ref[...] += jnp.sum(x.astype(jnp.float32), axis=1, keepdims=True)


def _norm_kernel(x_ref, w_ref, a_ref, b_ref, o_ref):
    """Pass 2: y = W @ X_tile on the MXU, fused BN affine o = y*a + b."""
    y = jnp.dot(w_ref[...], x_ref[...], preferred_element_type=jnp.float32)
    o_ref[...] = (y * a_ref[...] + b_ref[...]).astype(o_ref.dtype)


def _pick_spatial_tile(S, cin, cout, budget_bytes=TILE_VMEM_BUDGET):
    """Largest lane-dense spatial tile that divides S exactly (exact statistics,
    no padded lanes) while keeping double-buffered x/out tiles inside the budget."""
    per_lane = 2 * (cin * 2 + cout * 4)          # 2 buffers * (bf16 x col + f32 out col)
    cap = int(min(max(budget_bytes // max(per_lane, 1), 128), 8192))
    if S <= cap:
        return S
    t = (cap // 128) * 128
    while t >= 128:                              # prefer multiples of 128 (unmasked vst)
        if S % t == 0:
            return t
        t -= 128
    for t in range(cap, 7, -1):                  # any exact divisor under the cap
        if S % t == 0:
            return t
    return S                                     # one spatial tile per n (still correct)


def downsample_forward(x, conv_weight, gamma, beta, eps=EPS):
    """x: [N, Cin, H, W] (NCHW). conv_weight: [Cout, Cin, 1, 1]. gamma/beta: [Cout]."""
    N, Cin, H, W = x.shape
    Cout = conv_weight.shape[0]
    Ho, Wo = (H + 1) // 2, (W + 1) // 2
    S = Ho * Wo
    M = N * S

    # 1x1 / stride-2 conv == spatial subsample + per-pixel channel matmul.
    # TODO(synk): fold the stride-2 selection into the pass-1 BlockSpec to also skip
    # this XLA gather; element-granular strided DMA + the (8,128) rule make it fragile.
    xs = x[:, :, ::2, ::2].reshape(N, Cin, S)
    xb = xs.astype(jnp.bfloat16)                       # MXU operands bf16, f32 acc
    wb = conv_weight.reshape(Cout, Cin).astype(jnp.bfloat16)

    tS = _pick_spatial_tile(S, Cin, Cout)
    grid = (N, S // tS)

    x_spec = pl.BlockSpec((None, Cin, tS), lambda n, s: (n, 0, s))

    x_bytes = M * Cin * 2
    w_bytes = Cout * Cin * 2
    out_bytes = M * Cout * jnp.dtype(x.dtype).itemsize

    # ---- pass 1: per-n partial Gram matrix & channel sums (W never touched) ----
    pgram, psum = pl.pallas_call(
        _stats_kernel,
        out_shape=(jax.ShapeDtypeStruct((N, Cin, Cin), jnp.float32),
                   jax.ShapeDtypeStruct((N, Cin, 1), jnp.float32)),
        grid=grid,
        in_specs=[x_spec],
        out_specs=(pl.BlockSpec((None, Cin, Cin), lambda n, s: (n, 0, 0)),
                   pl.BlockSpec((None, Cin, 1), lambda n, s: (n, 0, 0))),
        compiler_params=pltpu.CompilerParams(
            dimension_semantics=("parallel", "arbitrary"),
            vmem_limit_bytes=VMEM_LIMIT),
        cost_estimate=pl.CostEstimate(
            flops=2 * M * Cin * Cin + 2 * M * Cin,
            transcendentals=0,
            bytes_accessed=x_bytes + N * (Cin * Cin + Cin) * 4),
    )(xb)

    # ---- tiny glue on [Cin]/[Cout] tensors: exact batch stats of y = W @ X ----
    # sum(y) = W @ sum(x);  sum(y^2) = rowsum((W @ G) * W)  with G = sum(x x^T).
    wf = wb.astype(jnp.float32)                        # bf16-consistent with pass 2
    gram = jnp.sum(pgram, axis=0)                      # [Cin, Cin]
    sx = jnp.sum(psum, axis=0)[:, 0]                   # [Cin]
    ysum = wf @ sx                                     # [Cout]
    ysq = jnp.sum((wf @ gram) * wf, axis=1)            # [Cout]
    mean = ysum / M
    var = jnp.maximum(ysq / M - mean * mean, 0.0)      # biased (training-mode) variance
    scale = gamma.astype(jnp.float32) * lax.rsqrt(var + eps)
    shift = beta.astype(jnp.float32) - mean * scale
    scale = scale.reshape(Cout, 1)
    shift = shift.reshape(Cout, 1)

    # ---- pass 2: matmul + fused normalize, fully tiled & double-buffered ----
    out = pl.pallas_call(
        _norm_kernel,
        out_shape=jax.ShapeDtypeStruct((N, Cout, S), x.dtype),
        grid=grid,
        in_specs=[x_spec,
                  pl.BlockSpec((Cout, Cin), lambda n, s: (0, 0)),
                  pl.BlockSpec((Cout, 1), lambda n, s: (0, 0)),
                  pl.BlockSpec((Cout, 1), lambda n, s: (0, 0))],
        out_specs=pl.BlockSpec((None, Cout, tS), lambda n, s: (n, 0, s)),
        compiler_params=pltpu.CompilerParams(
            dimension_semantics=("parallel", "parallel"),
            vmem_limit_bytes=VMEM_LIMIT),
        cost_estimate=pl.CostEstimate(
            flops=2 * M * Cin * Cout + 2 * M * Cout,
            transcendentals=0,
            bytes_accessed=x_bytes + w_bytes + out_bytes + 2 * Cout * 4),
    )(xb, wb, scale, shift)

    return out.reshape(N, Cout, Ho, Wo)


def _reference(x, conv_weight, gamma, beta, eps=EPS, operand_dtype=jnp.float32):
    """Pure-JAX reference (PyTorch training-mode BN semantics). `operand_dtype`
    lets us build a bf16-consistent reference for a tight numeric comparison."""
    Cout, Cin = conv_weight.shape[:2]
    xs = x[:, :, ::2, ::2].astype(operand_dtype).astype(jnp.float32)
    wm = conv_weight.reshape(Cout, Cin).astype(operand_dtype).astype(jnp.float32)
    y = jnp.einsum("ncij,oc->noij", xs, wm)
    mean = jnp.mean(y, axis=(0, 2, 3), keepdims=True)
    var = jnp.mean(jnp.square(y - mean), axis=(0, 2, 3), keepdims=True)
    yn = (y - mean) * lax.rsqrt(var + eps)
    return yn * gamma.reshape(1, Cout, 1, 1) + beta.reshape(1, Cout, 1, 1)


if __name__ == "__main__":
    key = jax.random.PRNGKey(0)
    k_x, k_w = jax.random.split(key)

    N, Cin, H, W = 2, 4, 16, 16
    Cout = 8

    x = jax.random.normal(k_x, (N, Cin, H, W), dtype=jnp.float32)
    # Conv2d(Cin, Cout, kernel_size=1, stride=2, bias=False) weight
    conv_weight = jax.random.normal(k_w, (Cout, Cin, 1, 1), dtype=jnp.float32) * 0.1
    # BatchNorm2d defaults: gamma=1, beta=0 (training mode -> batch statistics)
    gamma = jnp.ones((Cout,), dtype=jnp.float32)
    beta = jnp.zeros((Cout,), dtype=jnp.float32)

    fwd = jax.jit(downsample_forward)
    out = jax.block_until_ready(fwd(x, conv_weight, gamma, beta))

    assert out.shape == (N, Cout, H // 2, W // 2), out.shape

    # Tight check against a bf16-consistent reference (same conv numerics as the kernel).
    ref_bf16 = _reference(x, conv_weight, gamma, beta, operand_dtype=jnp.bfloat16)
    assert jnp.allclose(out, ref_bf16, atol=1e-3, rtol=1e-3), "mismatch vs bf16-consistent reference"

    # Loose sanity check against the full-f32 PyTorch-equivalent reference.
    ref_f32 = _reference(x, conv_weight, gamma, beta)
    assert jnp.allclose(out, ref_f32, atol=1e-1, rtol=1e-1), "mismatch vs f32 reference"

    print("KERNEL_OK")
</pallas_src>

<mosaic_0001>
module attributes {stable_mosaic.version = 11 : i64} {
  func.func @_stats_kernel(%arg0: i32, %arg1: i32, %arg2: memref<1x4x64xbf16, #tpu.memory_space<vmem>>, %arg3: memref<1x4x4xf32, #tpu.memory_space<vmem>>, %arg4: memref<1x4x1xf32, #tpu.memory_space<vmem>>) attributes {dimension_semantics = [#tpu.dimension_semantics<parallel>, #tpu.dimension_semantics<arbitrary>], iteration_bounds = array<i64: 2, 1>, scalar_prefetch = 0 : i64, scratch_operands = 0 : i64, tpu.core_type = #tpu.core_type<tc>, window_params = [{transform_indices = @transform_0, window_bounds = array<i64: 1, 4, 64>}, {transform_indices = @transform_1, window_bounds = array<i64: 1, 4, 4>}, {transform_indices = @transform_2, window_bounds = array<i64: 1, 4, 1>}]} {
    %c0_i32 = arith.constant 0 : i32
    %0 = arith.cmpi eq, %arg1, %c0_i32 : i32
    %1 = arith.extui %0 : i1 to i32
    %c0_i32_0 = arith.constant 0 : i32
    %2 = arith.cmpi ne, %1, %c0_i32_0 : i32
    scf.if %2 {
      %cst_16 = arith.constant 0.000000e+00 : f32
      %21 = vector.broadcast %cst_16 : f32 to vector<4x4xf32>
      %c0_17 = arith.constant 0 : index
      %c0_18 = arith.constant 0 : index
      %c0_19 = arith.constant 0 : index
      %22 = vector.load %arg3[%c0_17, %c0_18, %c0_19] : memref<1x4x4xf32, #tpu.memory_space<vmem>>, vector<1x4x4xf32>
      %23 = vector.shape_cast %22 : vector<1x4x4xf32> to vector<4x4xf32>
      %24 = vector.shape_cast %21 : vector<4x4xf32> to vector<1x4x4xf32>
      tpu.vector_store %arg3[%c0_17, %c0_18, %c0_19], %24 {strides = array<i32>} : memref<1x4x4xf32, #tpu.memory_space<vmem>>, vector<1x4x4xf32>,
      %cst_20 = arith.constant 0.000000e+00 : f32
      %25 = vector.broadcast %cst_20 : f32 to vector<4x1xf32>
      %c0_21 = arith.constant 0 : index
      %c0_22 = arith.constant 0 : index
      %c0_23 = arith.constant 0 : index
      %26 = vector.load %arg4[%c0_21, %c0_22, %c0_23] : memref<1x4x1xf32, #tpu.memory_space<vmem>>, vector<1x4x1xf32>
      %27 = vector.shape_cast %26 : vector<1x4x1xf32> to vector<4x1xf32>
      %28 = vector.shape_cast %25 : vector<4x1xf32> to vector<1x4x1xf32>
      tpu.vector_store %arg4[%c0_21, %c0_22, %c0_23], %28 {strides = array<i32>} : memref<1x4x1xf32, #tpu.memory_space<vmem>>, vector<1x4x1xf32>,
    } else {
    }
    %c0 = arith.constant 0 : index
    %c0_1 = arith.constant 0 : index
    %c0_2 = arith.constant 0 : index
    %3 = vector.load %arg2[%c0, %c0_1, %c0_2] : memref<1x4x64xbf16, #tpu.memory_space<vmem>>, vector<1x4x64xbf16>
    %4 = vector.shape_cast %3 : vector<1x4x64xbf16> to vector<4x64xbf16>
    %c0_3 = arith.constant 0 : index
    %c0_4 = arith.constant 0 : index
    %c0_5 = arith.constant 0 : index
    %5 = vector.load %arg3[%c0_3, %c0_4, %c0_5] : memref<1x4x4xf32, #tpu.memory_space<vmem>>, vector<1x4x4xf32>
    %6 = vector.shape_cast %5 : vector<1x4x4xf32> to vector<4x4xf32>
    %cst = arith.constant dense<0.000000e+00> : vector<4x4xf32>
    %7 = tpu.matmul %4, %4, %cst {dimension_numbers = #tpu.dot_dimension_numbers<[1], [1], [0], [0], [0, 0, 1, 0], [], []>} : vector<4x64xbf16>, vector<4x64xbf16>, vector<4x4xf32> -> vector<4x4xf32>
    %8 = arith.addf %6, %7 : vector<4x4xf32>
    %c0_6 = arith.constant 0 : index
    %c0_7 = arith.constant 0 : index
    %c0_8 = arith.constant 0 : index
    %9 = vector.load %arg3[%c0_6, %c0_7, %c0_8] : memref<1x4x4xf32, #tpu.memory_space<vmem>>, vector<1x4x4xf32>
    %10 = vector.shape_cast %9 : vector<1x4x4xf32> to vector<4x4xf32>
    %11 = vector.shape_cast %8 : vector<4x4xf32> to vector<1x4x4xf32>
    tpu.vector_store %arg3[%c0_6, %c0_7, %c0_8], %11 {strides = array<i32>} : memref<1x4x4xf32, #tpu.memory_space<vmem>>, vector<1x4x4xf32>,
    %c0_9 = arith.constant 0 : index
    %c0_10 = arith.constant 0 : index
    %c0_11 = arith.constant 0 : index
    %12 = vector.load %arg4[%c0_9, %c0_10, %c0_11] : memref<1x4x1xf32, #tpu.memory_space<vmem>>, vector<1x4x1xf32>
    %13 = vector.shape_cast %12 : vector<1x4x1xf32> to vector<4x1xf32>
    %14 = arith.extf %4 : vector<4x64xbf16> to vector<4x64xf32>
    %cst_12 = arith.constant dense<0.000000e+00> : vector<4xf32>
    %15 = vector.multi_reduction <add>, %14, %cst_12 [1] : vector<4x64xf32> to vector<4xf32>
    %16 = vector.shape_cast %15 : vector<4xf32> to vector<4x1xf32>
    %17 = arith.addf %13, %16 : vector<4x1xf32>
    %c0_13 = arith.constant 0 : index
    %c0_14 = arith.constant 0 : index
    %c0_15 = arith.constant 0 : index
    %18 = vector.load %arg4[%c0_13, %c0_14, %c0_15] : memref<1x4x1xf32, #tpu.memory_space<vmem>>, vector<1x4x1xf32>
    %19 = vector.shape_cast %18 : vector<1x4x1xf32> to vector<4x1xf32>
    %20 = vector.shape_cast %17 : vector<4x1xf32> to vector<1x4x1xf32>
    tpu.vector_store %arg4[%c0_13, %c0_14, %c0_15], %20 {strides = array<i32>} : memref<1x4x1xf32, #tpu.memory_space<vmem>>, vector<1x4x1xf32>,
    return
  }
  func.func @transform_0(%arg0: i32, %arg1: i32) -> (i32, i32, i32) {
    %c0_i32 = arith.constant 0 : i32
    %c0_i32_0 = arith.constant 0 : i32
    return %arg0, %c0_i32, %arg1 : i32, i32, i32
  }
  func.func @transform_1(%arg0: i32, %arg1: i32) -> (i32, i32, i32) {
    %c0_i32 = arith.constant 0 : i32
    %c0_i32_0 = arith.constant 0 : i32
    %c0_i32_1 = arith.constant 0 : i32
    return %arg0, %c0_i32, %c0_i32_0 : i32, i32, i32
  }
  func.func @transform_2(%arg0: i32, %arg1: i32) -> (i32, i32, i32) {
    %c0_i32 = arith.constant 0 : i32
    %c0_i32_0 = arith.constant 0 : i32
    %c0_i32_1 = arith.constant 0 : i32
    return %arg0, %c0_i32, %c0_i32_0 : i32, i32, i32
  }
}

module attributes {stable_mosaic.version = 11 : i64} {
  func.func @_norm_kernel(%arg0: i32, %arg1: i32, %arg2: memref<1x4x64xbf16, #tpu.memory_space<vmem>>, %arg3: memref<8x4xbf16, #tpu.memory_space<vmem>>, %arg4: memref<8x1xf32, #tpu.memory_space<vmem>>, %arg5: memref<8x1xf32, #tpu.memory_space<vmem>>, %arg6: memref<1x8x64xf32, #tpu.memory_space<vmem>>) attributes {dimension_semantics = [#tpu.dimension_semantics<parallel>, #tpu.dimension_semantics<parallel>], iteration_bounds = array<i64: 2, 1>, scalar_prefetch = 0 : i64, scratch_operands = 0 : i64, tpu.core_type = #tpu.core_type<tc>, window_params = [{transform_indices = @transform_0, window_bounds = array<i64: 1, 4, 64>}, {pipeline_mode = #tpu.pipeline_mode<synchronous>, transform_indices = @transform_1, window_bounds = array<i64: 8, 4>}, {pipeline_mode = #tpu.pipeline_mode<synchronous>, transform_indices = @transform_2, window_bounds = array<i64: 8, 1>}, {pipeline_mode = #tpu.pipeline_mode<synchronous>, transform_indices = @transform_3, window_bounds = array<i64: 8, 1>}, {transform_indices = @transform_4, window_bounds = array<i64: 1, 8, 64>}]} {
    %c0 = arith.constant 0 : index
    %c0_0 = arith.constant 0 : index
    %0 = vector.load %arg3[%c0, %c0_0] : memref<8x4xbf16, #tpu.memory_space<vmem>>, vector<8x4xbf16>
    %c0_1 = arith.constant 0 : index
    %c0_2 = arith.constant 0 : index
    %c0_3 = arith.constant 0 : index
    %1 = vector.load %arg2[%c0_1, %c0_2, %c0_3] : memref<1x4x64xbf16, #tpu.memory_space<vmem>>, vector<1x4x64xbf16>
    %2 = vector.shape_cast %1 : vector<1x4x64xbf16> to vector<4x64xbf16>
    %cst = arith.constant dense<0.000000e+00> : vector<8x64xf32>
    %3 = tpu.matmul %0, %2, %cst {dimension_numbers = #tpu.dot_dimension_numbers<[1], [0], [0], [1], [0, 0, 1, 1], [], []>} : vector<8x4xbf16>, vector<4x64xbf16>, vector<8x64xf32> -> vector<8x64xf32>
    %c0_4 = arith.constant 0 : index
    %c0_5 = arith.constant 0 : index
    %4 = vector.load %arg4[%c0_4, %c0_5] : memref<8x1xf32, #tpu.memory_space<vmem>>, vector<8x1xf32>
    %5 = vector.broadcast %4 : vector<8x1xf32> to vector<8x64xf32>
    %6 = arith.mulf %3, %5 : vector<8x64xf32>
    %c0_6 = arith.constant 0 : index
    %c0_7 = arith.constant 0 : index
    %7 = vector.load %arg5[%c0_6, %c0_7] : memref<8x1xf32, #tpu.memory_space<vmem>>, vector<8x1xf32>
    %8 = vector.broadcast %7 : vector<8x1xf32> to vector<8x64xf32>
    %9 = arith.addf %6, %8 : vector<8x64xf32>
    %c0_8 = arith.constant 0 : index
    %c0_9 = arith.constant 0 : index
    %c0_10 = arith.constant 0 : index
    %10 = vector.load %arg6[%c0_8, %c0_9, %c0_10] : memref<1x8x64xf32, #tpu.memory_space<vmem>>, vector<1x8x64xf32>
    %11 = vector.shape_cast %10 : vector<1x8x64xf32> to vector<8x64xf32>
    %12 = vector.shape_cast %9 : vector<8x64xf32> to vector<1x8x64xf32>
    tpu.vector_store %arg6[%c0_8, %c0_9, %c0_10], %12 {strides = array<i32>} : memref<1x8x64xf32, #tpu.memory_space<vmem>>, vector<1x8x64xf32>,
    return
  }
  func.func @transform_0(%arg0: i32, %arg1: i32) -> (i32, i32, i32) {
    %c0_i32 = arith.constant 0 : i32
    %c0_i32_0 = arith.constant 0 : i32
    return %arg0, %c0_i32, %arg1 : i32, i32, i32
  }
  func.func @transform_1(%arg0: i32, %arg1: i32) -> (i32, i32) {
    %c0_i32 = arith.constant 0 : i32
    %c0_i32_0 = arith.constant 0 : i32
    %c0_i32_1 = arith.constant 0 : i32
    return %c0_i32, %c0_i32_0 : i32, i32
  }
  func.func @transform_2(%arg0: i32, %arg1: i32) -> (i32, i32) {
    %c0_i32 = arith.constant 0 : i32
    %c0_i32_0 = arith.constant 0 : i32
    %c0_i32_1 = arith.constant 0 : i32
    return %c0_i32, %c0_i32_0 : i32, i32
  }
  func.func @transform_3(%arg0: i32, %arg1: i32) -> (i32, i32) {
    %c0_i32 = arith.constant 0 : i32
    %c0_i32_0 = arith.constant 0 : i32
    %c0_i32_1 = arith.constant 0 : i32
    return %c0_i32, %c0_i32_0 : i32, i32
  }
  func.func @transform_4(%arg0: i32, %arg1: i32) -> (i32, i32, i32) {
    %c0_i32 = arith.constant 0 : i32
    %c0_i32_0 = arith.constant 0 : i32
    return %arg0, %c0_i32, %arg1 : i32, i32, i32
  }
}

</mosaic_0001>

<bundles_post_ra>
// kernel: downsample_forward.2
= control target key start
LH: loop header
LB: loop body
LE: loop exit
PB: predicated region body
PF: predicated region fallthrough
CT: control target
= control target key end

     0   :  { %s384_s9 = smov 0   ;;  %s386_s10 = smov 0   ;;  %s422_s0 = inlined_call_operand.vmem [shape: bf16[2,4,64], index: 0, kind: input, shape index: {}]   ;;  %s423_s1 = inlined_call_operand.vmem [shape: f32[2,4,4], index: 1, kind: output, shape index: {0}]   ;;  %s424_s2 = inlined_call_operand.vmem [shape: f32[2,4,1], index: 2, kind: output, shape index: {1}]  }
   0x1   :  { %s388_s11 = smov 0  }
   0x2 LB: > { %s25_s12 = sadd.s32 1, %s362_s10  ;;  %p312_p0 = scmp.ge.s32.totalorder %s366_s11, 1  ;;  %s366_s11 = sphi %s388_s11, %s13_s11   ;;  %s362_s10 = sphi %s386_s10, %s426_s10   ;;  %s358_s9 = sphi %s384_s9, %s425_s9  }
   0x3   : > { %p27_p1 = scmp.ge.s32.totalorder %s25_s12, 2  ;;  %p131_p2 = scmp.lt.s32.totalorder %s366_s11, 3 }
   0x5   : > { %s428_s12 = smov (%p27_p1, %s25_s12), 0  ;;  %p132_p3 = pnand %p312_p0, %p131_p2 }
   0x6   : > { %p158_p4 = scmp.lt.s32.totalorder (!%p132_p3), %s358_s9, 1 }
   0x7   : > { %135 = sbr.rel (%p132_p3) target bundleno = 158 (0x9e), region = 24 }
   0xc   : > { %s430_s9 = smov (!%p158_p4, %s358_s9), 1  ;;  %vm178_vm0 = vcmask 27648   ;;  %vm184_vm1 = vcmask 523264   ;;  %vm206_vm2 = vcmask 519168   ;;  %v368_v1 = vmov 0.0  }
   0xd   : > { %s313_s13 = sshll.u32 %s430_s9, 1  ;;  %s314_s14 = sshll.u32 %s430_s9, 2  ;;  %vm180_vm3 = vcmask 3072  }
   0xe   : > { %s164_s17 = scalar_lea.vmem %s422_s0, %s313_s13  ;;  %s168_s20 = scalar_lea.vmem %s423_s1, %s314_s14 }
   0xf   : > { %v182_v0 = vld [vmem:[%s164_s17] sm:$0x3]  ;;  %179 = vst.msk [vmem:[%s168_s20] sm:$0xf] %vm178_vm0, %v368_v1  ;;  %s172_s23 = scalar_lea.vmem %s424_s2, %s314_s14 }
  0x10   : > { %v186_v2 = vsel %vm184_vm1, %v182_v0, 0  ;;  %v205_v3 = vunpack.c.l.bf16 %v182_v0  ;;  %181 = vst.msk [vmem:[%s172_s23] sm:$0xf] %vm180_vm3, %v368_v1 }
  0x11   : > { %195 = vmatpush.bf16.xpose.msra.mxu0 %v186_v2 }
  0x12   : > { %v207_v4 = vsel %vm206_vm2, %v205_v3, 0.0 }
  0x13   : > { %208 = vadd.xlane.f32.xlu0 %v207_v4 }
  0x16   : > { %v183_v8 = vld [vmem:[%s168_s20] sm:$0xf] }
  0x17   : > { %v204_v5 = vld [vmem:[%s172_s23] sm:$0xf] }
  0x18   : > { %316 = vmatmul.msk.bf16.vlgmr.msra.gmra.mxu0 %vm184_vm1, %v182_v0 }
  0x86   : > { %v209_v6 = vpop.xlane.xlu0 %208 }
  0x87   : > { %v210_v7 = vadd.f32 %v209_v6, %v204_v5 }
  0x89   : > { %212 = vst.msk [vmem:[%s172_s23] sm:$0xf] %vm180_vm3, %v210_v7 }
  0x95   : > { %v197_v9 = vpop.f32.mrf.mxu0 }
  0x96   : > { %v201_v10 = vadd.f32 %v197_v9, %v183_v8 }
  0x98   : > { %203 = vst.msk [vmem:[%s168_s20] sm:$0xf] %vm178_vm0, %v201_v10 }
  0x9d   : > { %v199_v11 = vpop.f32.mrf.mxu0 }
  0x9e PF: > { %s13_s11 = sadd.s32 1, %s366_s11   ;;  %s425_s9 = smov %s362_s10 }
  0x9f   : > { %p10_p5 = scmp.ge.s32.totalorder %s13_s11, 4   ;;  %s426_s10 = smov %s428_s12 }
  0xa1   :  { %12 = sbr.rel (!%p10_p5) target bundleno = 2 (0x2), region = 70 }

// kernel: downsample_forward.3
= control target key start
LH: loop header
LB: loop body
LE: loop exit
PB: predicated region body
PF: predicated region fallthrough
CT: control target
= control target key end

     0   :  { %s424_s15 = smov 0   ;;  %s426_s16 = smov 0   ;;  %s466_s0 = inlined_call_operand.vmem [shape: bf16[2,4,64], index: 0, kind: input, shape index: {}]   ;;  %s467_s1 = inlined_call_operand.vmem [shape: bf16[8,4], index: 1, kind: input, shape index: {}]   ;;  %s468_s2 = inlined_call_operand.vmem [shape: f32[8,1], index: 2, kind: input, shape index: {}]   ;;  %s469_s3 = inlined_call_operand.vmem [shape: f32[8,1], index: 3, kind: input, shape index: {}]   ;;  %s470_s4 = inlined_call_operand.vmem [shape: f32[2,8,64], index: 4, kind: output, shape index: {}]  }
   0x1   :  { %s428_s17 = smov 0  }
   0x2 LB: > { %s26_s18 = sadd.s32 1, %s392_s16  ;;  %p342_p0 = scmp.ge.s32.totalorder %s396_s17, 1  ;;  %s396_s17 = sphi %s428_s17, %s14_s17   ;;  %s392_s16 = sphi %s426_s16, %s472_s16   ;;  %s388_s15 = sphi %s424_s15, %s471_s15  }
   0x3   : > { %p28_p1 = scmp.ge.s32.totalorder %s26_s18, 2  ;;  %p180_p2 = scmp.lt.s32.totalorder %s396_s17, 3 }
   0x5   : > { %s474_s18 = smov (%p28_p1, %s26_s18), 0  ;;  %p181_p3 = pnand %p342_p0, %p180_p2 }
   0x6   : > { %p210_p4 = scmp.lt.s32.totalorder (!%p181_p3), %s388_s15, 1 }
   0x7   : > { %184 = sbr.rel (%p181_p3) target bundleno = 154 (0x9a), region = 36 }
   0xc   : > { %v248_v0 = vld [vmem:[%s468_s2] sm:$0xff]  ;;  %v398_v1 = vmov 0   ;;  %s476_s15 = smov (!%p210_p4, %s388_s15), 1  ;;  %vm231_vm0 = vcmask 1041408   ;;  %vm227_vm1 = vcmask 31744   ;;  %vm262_vm2 = vcmask 523264  }
   0xd   : > { %373 = vset.pattern.permute.xlu0 %v398_v1  ;;  %s343_s21 = sshll.u32 %s476_s15, 1  ;;  %v255_v4 = vld [vmem:[%s469_s3] sm:$0xff]  ;;  %s344_s29 = sshll.u32 %s476_s15, 3 }
   0xe   : > { %251 = vperm.xlu0 %373, %v248_v0   ;;  %s216_s24 = scalar_lea.vmem %s466_s0, %s343_s21  ;;  %v225_v5 = vld [vmem:[%s467_s1] sm:$0xf]  ;;  %s223_s6 = scalar_lea.vmem %s470_s4, %s344_s29 }
   0xf   : > { %v226_v2 = vld [vmem:[%s216_s24] sm:$0x3] }
  0x10   : > { %v233_v3 = vsel %vm231_vm0, %v226_v2, 0 }
  0x11   : > { %242 = vmatpush.bf16.msra.mxu0 %v233_v3 }
  0x14   : > { %345 = vmatmul.msk.bf16.vlgmr.msra.gmra.mxu0 %vm227_vm1, %v225_v5 }
  0x16   : > { %258 = vperm.xlu0 %373, %v255_v4  }
  0x80   : > { %v252_v6 = vpop.permute.xlu0 %251 }
  0x88   : > { %v259_v9 = vpop.permute.xlu0 %258 }
  0x91   : > { %v244_v7 = vpop.f32.mrf.mxu0 }
  0x92   : > { %v254_v8 = vmul.f32 %v252_v6, %v244_v7 }
  0x94   : > { %v261_v10 = vadd.f32 %v259_v9, %v254_v8 }
  0x96   : > { %263 = vst.msk [vmem:[%s223_s6] sm:$0xff] %vm262_vm2, %v261_v10 }
  0x99   : > { %v246_v11 = vpop.f32.mrf.mxu0 }
  0x9a PF: > { %s14_s17 = sadd.s32 1, %s396_s17   ;;  %s471_s15 = smov %s392_s16 }
  0x9b   : > { %p11_p5 = scmp.ge.s32.totalorder %s14_s17, 4   ;;  %s472_s16 = smov %s474_s18 }
  0x9d   :  { %13 = sbr.rel (!%p11_p5) target bundleno = 2 (0x2), region = 66 }

</bundles_post_ra>
